<compile_context>
chip_gen: v5e
topology: v5e:2x2
jax: 0.10.0
libtpu: 0.0.40
codegen_flags: <defaults>
</compile_context>

<pallas_src>
import jax
import jax.numpy as jnp
from jax.experimental import pallas as pl
from jax.experimental.pallas import tpu as pltpu


def _round_up(x, m):
    return ((x + m - 1) // m) * m


def _emb_gather_kernel(ids_ref, table_hbm, out_ref, buf_ref, copy_sem):
    """Gather one chunk of T embedding rows.

    ids_ref   : SMEM (n_padded,) int32  -- scalar-prefetched token ids
    table_hbm : HBM  (vocab, dim)       -- raw ref, manually DMA'd per row
    out_ref   : VMEM (T, dim)           -- dense output block for this chunk
    buf_ref   : VMEM (T, dim) scratch   -- DMA landing buffer
    copy_sem  : single DMA semaphore shared by the T row copies
    """
    t_chunk = out_ref.shape[0]
    base = pl.program_id(0) * t_chunk

    # Issue all T row-gather DMAs back-to-back so they are all in flight at
    # once (HBM latency amortized over the whole chunk).
    @pl.loop(0, t_chunk)
    def _start(t):
        row = ids_ref[base + t]
        pltpu.make_async_copy(table_hbm.at[row], buf_ref.at[t], copy_sem).start()

    # Wait for every row copy (same-size descriptors against the shared sem).
    @pl.loop(0, t_chunk)
    def _wait(t):
        pltpu.make_async_copy(table_hbm.at[0], buf_ref.at[t], copy_sem).wait()

    # One dense (T, dim) store -> unmasked full-tile output writeback.
    out_ref[...] = buf_ref[...]


def embedding_lookup(ids_flat, table, *, chunk_tokens=256):
    """Gather rows of `table` at `ids_flat`. ids_flat: (n,) ints, table: (vocab, dim)."""
    n = ids_flat.shape[0]
    vocab, dim = table.shape

    # torch.nn.Embedding raises on out-of-range ids; clamp so a bad id can
    # never become an out-of-bounds HBM DMA.
    ids = jnp.clip(ids_flat.astype(jnp.int32), 0, vocab - 1)

    # Tokens per grid step: multiple of 16 keeps the (T, dim) output block
    # sublane-dense for both f32 and bf16 tables.
    t_chunk = min(int(chunk_tokens), _round_up(n, 16))
    t_chunk = _round_up(t_chunk, 16)
    n_pad = _round_up(n, t_chunk)
    if n_pad != n:
        # Pad with id 0 (a valid row); padded rows are sliced off below.
        ids = jnp.pad(ids, (0, n_pad - n))
    n_chunks = n_pad // t_chunk

    grid_spec = pltpu.PrefetchScalarGridSpec(
        num_scalar_prefetch=1,                     # ids -> SMEM (kernel + index_maps)
        grid=(n_chunks,),
        in_specs=[
            pl.BlockSpec(memory_space=pl.ANY),     # table stays in HBM; manual row DMAs
        ],
        out_specs=pl.BlockSpec((t_chunk, dim), lambda c, ids: (c, 0)),
        scratch_shapes=[
            pltpu.VMEM((t_chunk, dim), table.dtype),   # DMA landing buffer
            pltpu.SemaphoreType.DMA(()),               # shared by the T row copies
        ],
    )

    out = pl.pallas_call(
        _emb_gather_kernel,
        out_shape=jax.ShapeDtypeStruct((n_pad, dim), table.dtype),
        grid_spec=grid_spec,
        compiler_params=pltpu.CompilerParams(
            # Chunks are independent -> shard across both TensorCores on v7x
            # (no-op on single-TC v5e/v6e).
            dimension_semantics=("parallel",),
            vmem_limit_bytes=32 * 1024 * 1024,
        ),
    )(ids, table)

    return out[:n]


def emb_forward(x, table):
    """Equivalent of Emb.forward: x (any int shape) -> x.shape + (dim,)."""
    dim = table.shape[1]
    ids_flat = x.reshape(-1)
    out_flat = embedding_lookup(ids_flat, table)
    return out_flat.reshape(x.shape + (dim,))


if __name__ == "__main__":
    # Small, module-consistent shapes (true Mixtral sizes are vocab=32000, dim=4096).
    VOCAB, DIM = 512, 256
    BATCH, SEQ = 2, 8

    key = jax.random.PRNGKey(0)
    k_table, k_ids = jax.random.split(key)

    # torch.nn.Embedding initializes weights ~ N(0, 1).
    table = jax.random.normal(k_table, (VOCAB, DIM), dtype=jnp.float32)
    x = jax.random.randint(k_ids, (BATCH, SEQ), 0, VOCAB, dtype=jnp.int32)

    out = jax.jit(emb_forward)(x, table)
    out = jax.block_until_ready(out)

    # Sanity check against the plain-JAX reference gather.
    ref = jnp.take(table, x.reshape(-1), axis=0).reshape(BATCH, SEQ, DIM)
    assert out.shape == (BATCH, SEQ, DIM)
    assert jnp.allclose(out, ref), "mismatch vs reference gather"

    print("KERNEL_OK")
</pallas_src>

<mosaic_0001>
module attributes {stable_mosaic.version = 11 : i64} {
  func.func @_emb_gather_kernel(%arg0: i32, %arg1: memref<16xi32, #tpu.memory_space<smem>>, %arg2: memref<512x256xf32, #tpu.memory_space<any>>, %arg3: memref<16x256xf32, #tpu.memory_space<vmem>>, %arg4: memref<16x256xf32, #tpu.memory_space<vmem>>, %arg5: memref<!tpu.dma_semaphore, #tpu.memory_space<semaphore_mem>>) attributes {dimension_semantics = [#tpu.dimension_semantics<parallel>], iteration_bounds = array<i64: 1>, scalar_prefetch = 1 : i64, scratch_operands = 2 : i64, tpu.core_type = #tpu.core_type<tc>, window_params = [{}, {transform_indices = @transform_1, window_bounds = array<i64: 16, 256>}]} {
    %c16_i32 = arith.constant 16 : i32
    %0 = arith.muli %arg0, %c16_i32 : i32
    %c0_i32 = arith.constant 0 : i32
    %c16_i32_0 = arith.constant 16 : i32
    %1 = arith.addi %c0_i32, %c16_i32_0 : i32
    %c1_i32 = arith.constant 1 : i32
    scf.for %arg6 = %c0_i32 to %1 step %c1_i32  : i32 {
      %c1_i32_9 = arith.constant 1 : i32
      %5 = arith.muli %arg6, %c1_i32_9 : i32
      %c0_i32_10 = arith.constant 0 : i32
      %6 = arith.addi %c0_i32_10, %5 : i32
      %7 = arith.addi %0, %6 : i32
      %8 = arith.index_cast %7 : i32 to index
      %9 = memref.load %arg1[%8] : memref<16xi32, #tpu.memory_space<smem>>
      %c0_i32_11 = arith.constant 0 : i32
      %10 = tpu.memref_slice %arg2[%9, %c0_i32_11] : memref<512x256xf32, #tpu.memory_space<any>> -> memref<1x256xf32, #tpu.memory_space<any>>
      %11 = tpu.memref_squeeze %10 : memref<1x256xf32, #tpu.memory_space<any>> -> memref<256xf32, #tpu.memory_space<any>>
      %c0_i32_12 = arith.constant 0 : i32
      %12 = tpu.memref_slice %arg4[%6, %c0_i32_12] : memref<16x256xf32, #tpu.memory_space<vmem>> -> memref<1x256xf32, #tpu.memory_space<vmem>>
      %13 = tpu.memref_squeeze %12 : memref<1x256xf32, #tpu.memory_space<vmem>> -> memref<256xf32, #tpu.memory_space<vmem>>
      tpu.enqueue_dma source(%11 : memref<256xf32, #tpu.memory_space<any>>) target(%13 : memref<256xf32, #tpu.memory_space<vmem>>) target_semaphore(%arg5 : memref<!tpu.dma_semaphore, #tpu.memory_space<semaphore_mem>>)
    }
    %c16_i32_1 = arith.constant 16 : i32
    %c0_i32_2 = arith.constant 0 : i32
    %c16_i32_3 = arith.constant 16 : i32
    %2 = arith.addi %c0_i32_2, %c16_i32_3 : i32
    %c1_i32_4 = arith.constant 1 : i32
    scf.for %arg6 = %c0_i32_2 to %2 step %c1_i32_4  : i32 {
      %c1_i32_9 = arith.constant 1 : i32
      %5 = arith.muli %arg6, %c1_i32_9 : i32
      %c0_i32_10 = arith.constant 0 : i32
      %6 = arith.addi %c0_i32_10, %5 : i32
      %c0_i32_11 = arith.constant 0 : i32
      %c0_i32_12 = arith.constant 0 : i32
      %7 = tpu.memref_slice %arg2[%c0_i32_11, %c0_i32_12] : memref<512x256xf32, #tpu.memory_space<any>> -> memref<1x256xf32, #tpu.memory_space<any>>
      %8 = tpu.memref_squeeze %7 : memref<1x256xf32, #tpu.memory_space<any>> -> memref<256xf32, #tpu.memory_space<any>>
      %c0_i32_13 = arith.constant 0 : i32
      %9 = tpu.memref_slice %arg4[%6, %c0_i32_13] : memref<16x256xf32, #tpu.memory_space<vmem>> -> memref<1x256xf32, #tpu.memory_space<vmem>>
      %10 = tpu.memref_squeeze %9 : memref<1x256xf32, #tpu.memory_space<vmem>> -> memref<256xf32, #tpu.memory_space<vmem>>
      tpu.wait_dma2 semaphore(%arg5 : memref<!tpu.dma_semaphore, #tpu.memory_space<semaphore_mem>>) src(%8 : memref<256xf32, #tpu.memory_space<any>>) dst(%10 : memref<256xf32, #tpu.memory_space<vmem>>)
    }
    %c16_i32_5 = arith.constant 16 : i32
    %c0 = arith.constant 0 : index
    %c0_6 = arith.constant 0 : index
    %3 = vector.load %arg4[%c0, %c0_6] : memref<16x256xf32, #tpu.memory_space<vmem>>, vector<16x256xf32>
    %c0_7 = arith.constant 0 : index
    %c0_8 = arith.constant 0 : index
    %4 = vector.load %arg3[%c0_7, %c0_8] : memref<16x256xf32, #tpu.memory_space<vmem>>, vector<16x256xf32>
    tpu.vector_store %arg3[%c0_7, %c0_8], %3 {strides = array<i32>} : memref<16x256xf32, #tpu.memory_space<vmem>>, vector<16x256xf32>,
    return
  }
  func.func @transform_1(%arg0: i32, %arg1: memref<16xi32, #tpu.memory_space<smem>>) -> (i32, i32) {
    %c0_i32 = arith.constant 0 : i32
    %c0_i32_0 = arith.constant 0 : i32
    return %arg0, %c0_i32 : i32, i32
  }
}

</mosaic_0001>

<bundles_post_ra>
// kernel: emb_forward.1
= control target key start
LH: loop header
LB: loop body
LE: loop exit
PB: predicated region body
PF: predicated region fallthrough
CT: control target
= control target key end

     0   :  { %s206_s12 = smov [#allocation5]   ;;  %s264_s0 = inlined_call_operand.vmem [shape: s32[16], index: 0, kind: input, shape index: {}]   ;;  %s265_s1 = inlined_call_operand.hbm [shape: f32[512,256], index: 1, kind: input, shape index: {}]   ;;  %s266_s2 = inlined_call_operand.hbm [shape: f32[16,256], index: 2, kind: output, shape index: {}]  }
   0x1   :  { %s8_s11 = sshll.u32 %s264_s0, 4  ;;  %s9_s11 = int_to_ptr.vmem [resolvable:$true] %s8_s11 }
   0x2   :  { %11 = dma.vmem_to_smem %s9_s11, 16, %s206_s12, [#allocation4] }
   0x3   :  { %192 = dma.done.wait [#allocation4], 16 }
   0x4   :  { %193 = vsyncadd [#allocation4], 4294967280 }
   0x5   :  { %14 = sfence }
   0x6   :  { %15 = vsyncpa [#allocation7], 0  ;;  %s231_s13 = smov 0  }
   0x7 LB: > { %s24_s14 = sld [smem:[#allocation5 + %s200_s13]]  ;;  %s30_s15 = sshrl.u32 %s200_s13, 3  ;;  %s200_s13 = sphi %s231_s13, %s22_s13  }
   0x8   : > { %s31_s0 = sand.u32 7, %s200_s13   ;;  %s100_s16 = sshll.u32 %s30_s15, 4 }
   0x9   : > { %s33_s17 = sadd.s32 %s100_s16, %s31_s0  ;;  %s140_s4 = scalar_lea.hbm %s265_s1, 1024 }
   0xa   : > { %s34_s18 = scalar_lea.vmem [#allocation2], %s33_s17 }
   0xb   : > { %s239_s19 = sshll.u32 %s34_s18, 4  ;;  %s38_s19 = int_to_ptr.vmem [resolvable:$true] %s239_s19 }
   0xd   : > { %s25_s20 = sshrl.u32 %s24_s14, 3  ;;  %s26_s21 = sand.u32 7, %s24_s14  }
   0xe   : > { %s99_s22 = sshll.u32 %s25_s20, 4 }
   0xf   : > { %s28_s23 = sadd.s32 %s99_s22, %s26_s21 }
  0x10   : > { %s29_s26 = scalar_lea.hbm %s265_s1, %s28_s23 }
  0x11   : > { %s245_s27 = sshll.u32 %s29_s26, 4  ;;  %s36_s27 = int_to_ptr.hbm [resolvable:$true] %s245_s27 }
  0x12   : > { %s136_s28 = sshra.s32 %s36_s27, 4  ;;  %s137_s28 = int_to_ptr.hbm [resolvable:$true] %s136_s28 }
  0x13   : > { %s138_s29 = scalar_lea.hbm %s137_s28, 2  ;;  %p141_p1 = scmp.lt.s32.totalorder %s137_s28, %s265_s1 }
  0x14   : > { %p139_p0 = scmp.ne.s32.totalorder %s137_s28, %s138_s29  ;;  %p142_p2 = scmp.lt.s32.totalorder %s140_s4, %s138_s29 }
  0x16   : > { %p143_p3 = por %p142_p2, %p141_p1 }
  0x18   : > { %p144_p4 = pnand %p143_p3, %p139_p0 }
  0x1a   : > { %147 = shalt.err (!%p144_p4)  }
  0x1b   : > { %s148_s7 = sshra.s32 %s38_s19, 4  ;;  %s207_s9 = smov [#allocation2]   ;;  %s149_s7 = int_to_ptr.vmem [resolvable:$true] %s148_s7 }
  0x1c   : > { %s150_s8 = scalar_lea.vmem %s149_s7, 2  ;;  %s152_s10 = scalar_lea.vmem %s207_s9, 32 }
  0x1d   : > { %p151_p5 = scmp.ne.s32.totalorder %s149_s7, %s150_s8  ;;  %p153_p6 = scmp.lt.s32.totalorder %s149_s7, [#allocation2] }
  0x1e   : > { %p154_p7 = scmp.lt.s32.totalorder %s152_s10, %s150_s8 }
  0x20   : > { %p155_p8 = por %p154_p7, %p153_p6 }
  0x22   : > { %p156_p9 = pnand %p155_p8, %p151_p5 }
  0x24   : > { %159 = shalt.err (!%p156_p9)  }
  0x25   : > { %s208_s11 = smov 128   ;;  %s209_s12 = smov 1  }
  0x26   : > { %42 = dma.hbm_to_vmem [thread:$0]  %s36_s27, 32, %s38_s19, [#allocation3], %s208_s11, %s208_s11, %s209_s12 }
  0x27   : > { %s22_s13 = sadd.s32 1, %s200_s13  }
  0x28   : > { %p19_p10 = scmp.ge.s32.totalorder %s22_s13, 16  }
  0x29   :  { %s202_s14 = smov (%p19_p10), 0  }
  0x2a   :  { %21 = sbr.rel (!%p19_p10) target bundleno = 7 (0x7), region = 36 }
  0x2f LB: > { %194 = dma.done.wait [#allocation3], 32  ;;  %s204_s14 = sphi %s202_s14, %s48_s14  }
  0x30   : > { %195 = vsyncadd [#allocation3], 4294967264  ;;  %s48_s14 = sadd.s32 1, %s204_s14  }
  0x31   : > { %p45_p11 = scmp.ge.s32.totalorder %s48_s14, 16  }
  0x32   :  { %v51_v0 = vld [vmem:[#allocation2] sm:$0xff] (%p45_p11)  ;;  %v52_v1 = vld [vmem:[#allocation2 + $0x8] sm:$0xff] (%p45_p11)  ;;  %v53_v2 = vld [vmem:[#allocation2 + $0x10] sm:$0xff] (%p45_p11)  ;;  %s65_s16 = sshll.u32 (%p45_p11), %s266_s2, 4  ;;  %s210_s13 = smov (%p45_p11), [#allocation6]   ;;  %s66_s16 = int_to_ptr.hbm [resolvable:$true] %s65_s16 }
  0x33   :  { %47 = sbr.rel (!%p45_p11) target bundleno = 47 (0x2f), region = 47  ;;  %55 = vst [vmem:[#allocation6] sm:$0xff] (%p45_p11), %v51_v0  ;;  %v54_v3 = vld [vmem:[#allocation2 + $0x18] sm:$0xff] (%p45_p11)  ;;  %s63_s1 = sshll.u32 (%p45_p11), %s210_s13, 4  ;;  %s64_s1 = int_to_ptr.vmem [resolvable:$true] %s63_s1 }
  0x34   :  { %56 = vst [vmem:[#allocation6 + $0x8] sm:$0xff] (%p45_p11), %v52_v1  ;;  %s211_s17 = smov (%p45_p11), 256   ;;  %s212_s18 = smov (%p45_p11), 16  }
  0x35   :  { %57 = vst [vmem:[#allocation6 + $0x10] sm:$0xff] (%p45_p11), %v53_v2 }
  0x36   :  { %58 = vst [vmem:[#allocation6 + $0x18] sm:$0xff] (%p45_p11), %v54_v3 }
  0x37   :  { %71 = dma.vmem_to_hbm [thread:$0]  (%p45_p11), %s64_s1, 512, %s66_s16, [#allocation7], %s211_s17, %s211_s17, %s212_s18  }
  0x38   :  { %196 = dma.done.wait [#allocation7], 512  }
  0x39   :  { %197 = vsyncadd [#allocation7], 4294966784 }
  0x3a   :  { %76 = vsyncpa [#allocation7], 1 }
  0x3b   :  { %77 = vsyncmov [#allocation3] }
  0x3e   :  { %s78_s19 = vpop.sfrf %77 }
  0x3f   :  { %p101_p12 = scmp.ne.s32.totalorder %s78_s19, 0 }
  0x41   :  { %82 = shalt.err (%p101_p12)  }

</bundles_post_ra>
